<compile_context>
chip_gen: v5e
topology: v5e:2x2
jax: 0.10.0
libtpu: 0.0.40
codegen_flags: <defaults>
</compile_context>

<pallas_src>
import functools
import numpy as np
import jax
import jax.numpy as jnp
from jax import lax
from jax.experimental import pallas as pl
from jax.experimental.pallas import tpu as pltpu


# ----------------------------- Pallas kernel ------------------------------
def _conv_test_kernel(x_ref, w1_ref, w2_ref, w3_ref, b1_ref, b2_ref, b3_ref,
                      o_ref, *, img_w, n_batch, cin, hw):
    # x_ref : (N, Cin, H*W)      flattened NCHW image (pixels on lanes)
    # w1_ref: (9, Cout, Cin)     conv1 weight per tap, t = ki*3 + kj
    # w2_ref: (Cin, Cout)        conv2 weight (1x1)
    # w3_ref: (Cout, Cin)        conv3 weight (1x1)
    # b1_ref: (1, Cout)  b2_ref: (1, Cin)  b3_ref: (Cout, 1)
    # o_ref : (N, Cout, H*W)
    f32 = jnp.float32

    # ---- fold conv2 (Cout->Cin) and conv3 (Cin->Cout) into one matrix ----
    m = jnp.dot(w3_ref[...], w2_ref[...], preferred_element_type=f32)      # (Cout, Cout)
    b_eff = (jnp.sum(m * b1_ref[...], axis=1, keepdims=True)               # M @ b1
             + jnp.sum(w3_ref[...] * b2_ref[...], axis=1, keepdims=True)   # W3 @ b2
             + b3_ref[...])                                                # (Cout, 1)

    # ---- fused im2col: zero-extend the flat image so every 3x3 tap is a
    #      static lane-offset slice of width H*W.  Garbage columns only
    #      correspond to invalid (right/bottom border) output pixels. ----
    x = x_ref[...]                                                         # (N, Cin, H*W)
    zpad = jnp.zeros((n_batch, cin, 2 * img_w + 2), dtype=x.dtype)
    xz = jnp.concatenate([x, zpad], axis=-1)         # lane concat at a 128-aligned boundary
    offsets = [ki * img_w + kj for ki in range(3) for kj in range(3)]
    taps = [xz[:, :, d:d + hw] for d in offsets]                           # 9 x (N, Cin, H*W)

    # ---- per image: conv1 as 9 accumulated MXU passes, then the folded
    #      1x1 convs as one more matmul; pixels stay on the lane axis. ----
    for n in range(n_batch):
        z = jnp.dot(w1_ref[0], taps[0][n], preferred_element_type=f32)     # (Cout, H*W)
        for t in range(1, 9):
            z = z + jnp.dot(w1_ref[t], taps[t][n], preferred_element_type=f32)
        y = jnp.dot(m, z, preferred_element_type=f32) + b_eff              # (Cout, H*W)
        o_ref[n] = y.astype(o_ref.dtype)


# ------------------------------ host wrapper -------------------------------
@jax.jit
def conv_test_forward(x, w1, b1, w2, b2, w3, b3):
    """x: (N, Cin, H, W) float32.  Returns (N, Cout, H-2, W-2)."""
    N, Cin, H, W = x.shape
    Cout = w1.shape[0]
    Ho, Wo = H - 2, W - 2
    HW = H * W

    # Free / tiny input re-arrangements (no data-path transposes of x).
    x_flat = x.reshape(N, Cin, HW)                               # metadata-only
    w1t = jnp.transpose(w1, (2, 3, 0, 1)).reshape(9, Cout, Cin)  # per-tap (Cout, Cin)
    w2m = w2.reshape(Cin, Cout)
    w3m = w3.reshape(Cout, Cin)
    b1r = b1.reshape(1, Cout)
    b2r = b2.reshape(1, Cin)
    b3c = b3.reshape(Cout, 1)

    kernel = functools.partial(_conv_test_kernel,
                               img_w=W, n_batch=N, cin=Cin, hw=HW)

    cost = pl.CostEstimate(
        flops=2 * (Cout * Cin * Cout                 # fold M
                   + N * 9 * Cout * Cin * HW         # conv1 taps
                   + N * Cout * Cout * HW),          # folded 1x1 convs
        transcendentals=0,
        bytes_accessed=4 * (N * Cin * HW + 9 * Cout * Cin + 2 * Cin * Cout
                            + 2 * Cout + Cin + N * Cout * HW))

    out_flat = pl.pallas_call(
        kernel,
        out_shape=jax.ShapeDtypeStruct((N, Cout, HW), jnp.float32),
        grid=(1,),                                   # single step: no pipeline overhead
        in_specs=[
            pl.BlockSpec((N, Cin, HW), lambda i: (0, 0, 0)),
            pl.BlockSpec((9, Cout, Cin), lambda i: (0, 0, 0)),
            pl.BlockSpec((Cin, Cout), lambda i: (0, 0)),
            pl.BlockSpec((Cout, Cin), lambda i: (0, 0)),
            pl.BlockSpec((1, Cout), lambda i: (0, 0)),
            pl.BlockSpec((1, Cin), lambda i: (0, 0)),
            pl.BlockSpec((Cout, 1), lambda i: (0, 0)),
        ],
        out_specs=pl.BlockSpec((N, Cout, HW), lambda i: (0, 0, 0)),
        compiler_params=pltpu.CompilerParams(
            dimension_semantics=("arbitrary",)),
        cost_estimate=cost,
    )(x_flat, w1t, w2m, w3m, b1r, b2r, b3c)

    # Free reshape + one small slice dropping the invalid right/bottom border.
    return out_flat.reshape(N, Cout, H, W)[:, :, :Ho, :Wo]


# --------------------------- reference (pure JAX) ---------------------------
def _ref_forward(x, w1, b1, w2, b2, w3, b3):
    def conv(x, w, b):
        dn = lax.conv_dimension_numbers(x.shape, w.shape,
                                        ('NCHW', 'OIHW', 'NCHW'))
        y = lax.conv_general_dilated(x, w, (1, 1), 'VALID',
                                     dimension_numbers=dn)
        return y + b[None, :, None, None]
    return conv(conv(conv(x, w1, b1), w2, b2), w3, b3)


# ----------------------- deterministic parameter init -----------------------
def _kaiming_normal(key, shape):
    # shape = (out_c, in_c, kh, kw); fan_in mode, gain = sqrt(2)
    fan_in = shape[1] * shape[2] * shape[3]
    std = np.sqrt(2.0 / fan_in)
    return jax.random.normal(key, shape, dtype=jnp.float32) * std


if __name__ == "__main__":
    key = jax.random.PRNGKey(0)
    k_x, k_w1, k_w2, k_w3 = jax.random.split(key, 4)

    N, Cin, Cout, H, W = 2, 4, 8, 16, 16
    x = jax.random.normal(k_x, (N, Cin, H, W), dtype=jnp.float32)

    w1 = _kaiming_normal(k_w1, (Cout, Cin, 3, 3))
    w2 = _kaiming_normal(k_w2, (Cin, Cout, 1, 1))
    w3 = _kaiming_normal(k_w3, (Cout, Cin, 1, 1))
    b1 = jnp.zeros((Cout,), jnp.float32)   # nn.init.constant_(bias, 0)
    b2 = jnp.zeros((Cin,), jnp.float32)
    b3 = jnp.zeros((Cout,), jnp.float32)

    out = conv_test_forward(x, w1, b1, w2, b2, w3, b3)
    out = jax.block_until_ready(out)

    ref = _ref_forward(x, w1, b1, w2, b2, w3, b3)
    assert out.shape == (N, Cout, H - 2, W - 2), out.shape
    np.testing.assert_allclose(np.asarray(out), np.asarray(ref),
                               rtol=1e-4, atol=1e-4)
    print("KERNEL_OK")
</pallas_src>

<mosaic_0001>
module attributes {stable_mosaic.version = 11 : i64} {
  func.func @_conv_test_kernel(%arg0: i32, %arg1: memref<2x4x256xf32, #tpu.memory_space<vmem>>, %arg2: memref<9x8x4xf32, #tpu.memory_space<vmem>>, %arg3: memref<4x8xf32, #tpu.memory_space<vmem>>, %arg4: memref<8x4xf32, #tpu.memory_space<vmem>>, %arg5: memref<1x8xf32, #tpu.memory_space<vmem>>, %arg6: memref<1x4xf32, #tpu.memory_space<vmem>>, %arg7: memref<8x1xf32, #tpu.memory_space<vmem>>, %arg8: memref<2x8x256xf32, #tpu.memory_space<vmem>>) attributes {dimension_semantics = [#tpu.dimension_semantics<arbitrary>], iteration_bounds = array<i64: 1>, scalar_prefetch = 0 : i64, scratch_operands = 0 : i64, tpu.core_type = #tpu.core_type<tc>, window_params = [{pipeline_mode = #tpu.pipeline_mode<synchronous>, transform_indices = @transform_0, window_bounds = array<i64: 2, 4, 256>}, {pipeline_mode = #tpu.pipeline_mode<synchronous>, transform_indices = @transform_1, window_bounds = array<i64: 9, 8, 4>}, {pipeline_mode = #tpu.pipeline_mode<synchronous>, transform_indices = @transform_2, window_bounds = array<i64: 4, 8>}, {pipeline_mode = #tpu.pipeline_mode<synchronous>, transform_indices = @transform_3, window_bounds = array<i64: 8, 4>}, {pipeline_mode = #tpu.pipeline_mode<synchronous>, transform_indices = @transform_4, window_bounds = array<i64: 1, 8>}, {pipeline_mode = #tpu.pipeline_mode<synchronous>, transform_indices = @transform_5, window_bounds = array<i64: 1, 4>}, {pipeline_mode = #tpu.pipeline_mode<synchronous>, transform_indices = @transform_6, window_bounds = array<i64: 8, 1>}, {pipeline_mode = #tpu.pipeline_mode<synchronous>, transform_indices = @transform_7, window_bounds = array<i64: 2, 8, 256>}]} {
    %c0 = arith.constant 0 : index
    %c0_0 = arith.constant 0 : index
    %0 = vector.load %arg4[%c0, %c0_0] : memref<8x4xf32, #tpu.memory_space<vmem>>, vector<8x4xf32>
    %c0_1 = arith.constant 0 : index
    %c0_2 = arith.constant 0 : index
    %1 = vector.load %arg3[%c0_1, %c0_2] : memref<4x8xf32, #tpu.memory_space<vmem>>, vector<4x8xf32>
    %cst = arith.constant dense<0.000000e+00> : vector<8x8xf32>
    %2 = tpu.matmul %0, %1, %cst {dimension_numbers = #tpu.dot_dimension_numbers<[1], [0], [0], [1], [0, 0, 1, 1], [], []>} : vector<8x4xf32>, vector<4x8xf32>, vector<8x8xf32> -> vector<8x8xf32>
    %c0_3 = arith.constant 0 : index
    %c0_4 = arith.constant 0 : index
    %3 = vector.load %arg5[%c0_3, %c0_4] : memref<1x8xf32, #tpu.memory_space<vmem>>, vector<1x8xf32>
    %4 = vector.broadcast %3 : vector<1x8xf32> to vector<8x8xf32>
    %5 = arith.mulf %2, %4 : vector<8x8xf32>
    %cst_5 = arith.constant dense<0.000000e+00> : vector<8xf32>
    %6 = vector.multi_reduction <add>, %5, %cst_5 [1] : vector<8x8xf32> to vector<8xf32>
    %7 = vector.shape_cast %6 : vector<8xf32> to vector<8x1xf32>
    %c0_6 = arith.constant 0 : index
    %c0_7 = arith.constant 0 : index
    %8 = vector.load %arg4[%c0_6, %c0_7] : memref<8x4xf32, #tpu.memory_space<vmem>>, vector<8x4xf32>
    %c0_8 = arith.constant 0 : index
    %c0_9 = arith.constant 0 : index
    %9 = vector.load %arg6[%c0_8, %c0_9] : memref<1x4xf32, #tpu.memory_space<vmem>>, vector<1x4xf32>
    %10 = vector.broadcast %9 : vector<1x4xf32> to vector<8x4xf32>
    %11 = arith.mulf %8, %10 : vector<8x4xf32>
    %cst_10 = arith.constant dense<0.000000e+00> : vector<8xf32>
    %12 = vector.multi_reduction <add>, %11, %cst_10 [1] : vector<8x4xf32> to vector<8xf32>
    %13 = vector.shape_cast %12 : vector<8xf32> to vector<8x1xf32>
    %14 = arith.addf %7, %13 : vector<8x1xf32>
    %c0_11 = arith.constant 0 : index
    %c0_12 = arith.constant 0 : index
    %15 = vector.load %arg7[%c0_11, %c0_12] : memref<8x1xf32, #tpu.memory_space<vmem>>, vector<8x1xf32>
    %16 = arith.addf %14, %15 : vector<8x1xf32>
    %c0_13 = arith.constant 0 : index
    %c0_14 = arith.constant 0 : index
    %c0_15 = arith.constant 0 : index
    %17 = vector.load %arg1[%c0_13, %c0_14, %c0_15] : memref<2x4x256xf32, #tpu.memory_space<vmem>>, vector<2x4x256xf32>
    %cst_16 = arith.constant 0.000000e+00 : f32
    %18 = vector.broadcast %cst_16 : f32 to vector<2x4x34xf32>
    %19 = tpu.concatenate %17, %18 in 2 : vector<2x4x256xf32>, vector<2x4x34xf32> -> vector<2x4x290xf32>
    %20 = vector.extract_strided_slice %19 {offsets = [0, 0, 0], sizes = [2, 4, 256], strides = [1, 1, 1]} : vector<2x4x290xf32> to vector<2x4x256xf32>
    %21 = vector.extract_strided_slice %19 {offsets = [0, 0, 1], sizes = [2, 4, 256], strides = [1, 1, 1]} : vector<2x4x290xf32> to vector<2x4x256xf32>
    %22 = vector.extract_strided_slice %19 {offsets = [0, 0, 2], sizes = [2, 4, 256], strides = [1, 1, 1]} : vector<2x4x290xf32> to vector<2x4x256xf32>
    %23 = vector.extract_strided_slice %19 {offsets = [0, 0, 16], sizes = [2, 4, 256], strides = [1, 1, 1]} : vector<2x4x290xf32> to vector<2x4x256xf32>
    %24 = vector.extract_strided_slice %19 {offsets = [0, 0, 17], sizes = [2, 4, 256], strides = [1, 1, 1]} : vector<2x4x290xf32> to vector<2x4x256xf32>
    %25 = vector.extract_strided_slice %19 {offsets = [0, 0, 18], sizes = [2, 4, 256], strides = [1, 1, 1]} : vector<2x4x290xf32> to vector<2x4x256xf32>
    %26 = vector.extract_strided_slice %19 {offsets = [0, 0, 32], sizes = [2, 4, 256], strides = [1, 1, 1]} : vector<2x4x290xf32> to vector<2x4x256xf32>
    %27 = vector.extract_strided_slice %19 {offsets = [0, 0, 33], sizes = [2, 4, 256], strides = [1, 1, 1]} : vector<2x4x290xf32> to vector<2x4x256xf32>
    %28 = vector.extract_strided_slice %19 {offsets = [0, 0, 34], sizes = [2, 4, 256], strides = [1, 1, 1]} : vector<2x4x290xf32> to vector<2x4x256xf32>
    %c0_17 = arith.constant 0 : index
    %c0_18 = arith.constant 0 : index
    %c0_19 = arith.constant 0 : index
    %29 = vector.load %arg2[%c0_17, %c0_18, %c0_19] : memref<9x8x4xf32, #tpu.memory_space<vmem>>, vector<1x8x4xf32>
    %30 = vector.shape_cast %29 : vector<1x8x4xf32> to vector<8x4xf32>
    %31 = vector.extract_strided_slice %20 {offsets = [0, 0, 0], sizes = [1, 4, 256], strides = [1, 1, 1]} : vector<2x4x256xf32> to vector<1x4x256xf32>
    %32 = vector.shape_cast %31 : vector<1x4x256xf32> to vector<4x256xf32>
    %cst_20 = arith.constant dense<0.000000e+00> : vector<8x256xf32>
    %33 = tpu.matmul %30, %32, %cst_20 {dimension_numbers = #tpu.dot_dimension_numbers<[1], [0], [0], [1], [0, 0, 1, 1], [], []>} : vector<8x4xf32>, vector<4x256xf32>, vector<8x256xf32> -> vector<8x256xf32>
    %c1 = arith.constant 1 : index
    %c0_21 = arith.constant 0 : index
    %c0_22 = arith.constant 0 : index
    %34 = vector.load %arg2[%c1, %c0_21, %c0_22] : memref<9x8x4xf32, #tpu.memory_space<vmem>>, vector<1x8x4xf32>
    %35 = vector.shape_cast %34 : vector<1x8x4xf32> to vector<8x4xf32>
    %36 = vector.extract_strided_slice %21 {offsets = [0, 0, 0], sizes = [1, 4, 256], strides = [1, 1, 1]} : vector<2x4x256xf32> to vector<1x4x256xf32>
    %37 = vector.shape_cast %36 : vector<1x4x256xf32> to vector<4x256xf32>
    %cst_23 = arith.constant dense<0.000000e+00> : vector<8x256xf32>
    %38 = tpu.matmul %35, %37, %cst_23 {dimension_numbers = #tpu.dot_dimension_numbers<[1], [0], [0], [1], [0, 0, 1, 1], [], []>} : vector<8x4xf32>, vector<4x256xf32>, vector<8x256xf32> -> vector<8x256xf32>
    %39 = arith.addf %33, %38 : vector<8x256xf32>
    %c2 = arith.constant 2 : index
    %c0_24 = arith.constant 0 : index
    %c0_25 = arith.constant 0 : index
    %40 = vector.load %arg2[%c2, %c0_24, %c0_25] : memref<9x8x4xf32, #tpu.memory_space<vmem>>, vector<1x8x4xf32>
    %41 = vector.shape_cast %40 : vector<1x8x4xf32> to vector<8x4xf32>
    %42 = vector.extract_strided_slice %22 {offsets = [0, 0, 0], sizes = [1, 4, 256], strides = [1, 1, 1]} : vector<2x4x256xf32> to vector<1x4x256xf32>
    %43 = vector.shape_cast %42 : vector<1x4x256xf32> to vector<4x256xf32>
    %cst_26 = arith.constant dense<0.000000e+00> : vector<8x256xf32>
    %44 = tpu.matmul %41, %43, %cst_26 {dimension_numbers = #tpu.dot_dimension_numbers<[1], [0], [0], [1], [0, 0, 1, 1], [], []>} : vector<8x4xf32>, vector<4x256xf32>, vector<8x256xf32> -> vector<8x256xf32>
    %45 = arith.addf %39, %44 : vector<8x256xf32>
    %c3 = arith.constant 3 : index
    %c0_27 = arith.constant 0 : index
    %c0_28 = arith.constant 0 : index
    %46 = vector.load %arg2[%c3, %c0_27, %c0_28] : memref<9x8x4xf32, #tpu.memory_space<vmem>>, vector<1x8x4xf32>
    %47 = vector.shape_cast %46 : vector<1x8x4xf32> to vector<8x4xf32>
    %48 = vector.extract_strided_slice %23 {offsets = [0, 0, 0], sizes = [1, 4, 256], strides = [1, 1, 1]} : vector<2x4x256xf32> to vector<1x4x256xf32>
    %49 = vector.shape_cast %48 : vector<1x4x256xf32> to vector<4x256xf32>
    %cst_29 = arith.constant dense<0.000000e+00> : vector<8x256xf32>
    %50 = tpu.matmul %47, %49, %cst_29 {dimension_numbers = #tpu.dot_dimension_numbers<[1], [0], [0], [1], [0, 0, 1, 1], [], []>} : vector<8x4xf32>, vector<4x256xf32>, vector<8x256xf32> -> vector<8x256xf32>
    %51 = arith.addf %45, %50 : vector<8x256xf32>
    %c4 = arith.constant 4 : index
    %c0_30 = arith.constant 0 : index
    %c0_31 = arith.constant 0 : index
    %52 = vector.load %arg2[%c4, %c0_30, %c0_31] : memref<9x8x4xf32, #tpu.memory_space<vmem>>, vector<1x8x4xf32>
    %53 = vector.shape_cast %52 : vector<1x8x4xf32> to vector<8x4xf32>
    %54 = vector.extract_strided_slice %24 {offsets = [0, 0, 0], sizes = [1, 4, 256], strides = [1, 1, 1]} : vector<2x4x256xf32> to vector<1x4x256xf32>
    %55 = vector.shape_cast %54 : vector<1x4x256xf32> to vector<4x256xf32>
    %cst_32 = arith.constant dense<0.000000e+00> : vector<8x256xf32>
    %56 = tpu.matmul %53, %55, %cst_32 {dimension_numbers = #tpu.dot_dimension_numbers<[1], [0], [0], [1], [0, 0, 1, 1], [], []>} : vector<8x4xf32>, vector<4x256xf32>, vector<8x256xf32> -> vector<8x256xf32>
    %57 = arith.addf %51, %56 : vector<8x256xf32>
    %c5 = arith.constant 5 : index
    %c0_33 = arith.constant 0 : index
    %c0_34 = arith.constant 0 : index
    %58 = vector.load %arg2[%c5, %c0_33, %c0_34] : memref<9x8x4xf32, #tpu.memory_space<vmem>>, vector<1x8x4xf32>
    %59 = vector.shape_cast %58 : vector<1x8x4xf32> to vector<8x4xf32>
    %60 = vector.extract_strided_slice %25 {offsets = [0, 0, 0], sizes = [1, 4, 256], strides = [1, 1, 1]} : vector<2x4x256xf32> to vector<1x4x256xf32>
    %61 = vector.shape_cast %60 : vector<1x4x256xf32> to vector<4x256xf32>
    %cst_35 = arith.constant dense<0.000000e+00> : vector<8x256xf32>
    %62 = tpu.matmul %59, %61, %cst_35 {dimension_numbers = #tpu.dot_dimension_numbers<[1], [0], [0], [1], [0, 0, 1, 1], [], []>} : vector<8x4xf32>, vector<4x256xf32>, vector<8x256xf32> -> vector<8x256xf32>
    %63 = arith.addf %57, %62 : vector<8x256xf32>
    %c6 = arith.constant 6 : index
    %c0_36 = arith.constant 0 : index
    %c0_37 = arith.constant 0 : index
    %64 = vector.load %arg2[%c6, %c0_36, %c0_37] : memref<9x8x4xf32, #tpu.memory_space<vmem>>, vector<1x8x4xf32>
    %65 = vector.shape_cast %64 : vector<1x8x4xf32> to vector<8x4xf32>
    %66 = vector.extract_strided_slice %26 {offsets = [0, 0, 0], sizes = [1, 4, 256], strides = [1, 1, 1]} : vector<2x4x256xf32> to vector<1x4x256xf32>
    %67 = vector.shape_cast %66 : vector<1x4x256xf32> to vector<4x256xf32>
    %cst_38 = arith.constant dense<0.000000e+00> : vector<8x256xf32>
    %68 = tpu.matmul %65, %67, %cst_38 {dimension_numbers = #tpu.dot_dimension_numbers<[1], [0], [0], [1], [0, 0, 1, 1], [], []>} : vector<8x4xf32>, vector<4x256xf32>, vector<8x256xf32> -> vector<8x256xf32>
    %69 = arith.addf %63, %68 : vector<8x256xf32>
    %c7 = arith.constant 7 : index
    %c0_39 = arith.constant 0 : index
    %c0_40 = arith.constant 0 : index
    %70 = vector.load %arg2[%c7, %c0_39, %c0_40] : memref<9x8x4xf32, #tpu.memory_space<vmem>>, vector<1x8x4xf32>
    %71 = vector.shape_cast %70 : vector<1x8x4xf32> to vector<8x4xf32>
    %72 = vector.extract_strided_slice %27 {offsets = [0, 0, 0], sizes = [1, 4, 256], strides = [1, 1, 1]} : vector<2x4x256xf32> to vector<1x4x256xf32>
    %73 = vector.shape_cast %72 : vector<1x4x256xf32> to vector<4x256xf32>
    %cst_41 = arith.constant dense<0.000000e+00> : vector<8x256xf32>
    %74 = tpu.matmul %71, %73, %cst_41 {dimension_numbers = #tpu.dot_dimension_numbers<[1], [0], [0], [1], [0, 0, 1, 1], [], []>} : vector<8x4xf32>, vector<4x256xf32>, vector<8x256xf32> -> vector<8x256xf32>
    %75 = arith.addf %69, %74 : vector<8x256xf32>
    %c8 = arith.constant 8 : index
    %c0_42 = arith.constant 0 : index
    %c0_43 = arith.constant 0 : index
    %76 = vector.load %arg2[%c8, %c0_42, %c0_43] : memref<9x8x4xf32, #tpu.memory_space<vmem>>, vector<1x8x4xf32>
    %77 = vector.shape_cast %76 : vector<1x8x4xf32> to vector<8x4xf32>
    %78 = vector.extract_strided_slice %28 {offsets = [0, 0, 0], sizes = [1, 4, 256], strides = [1, 1, 1]} : vector<2x4x256xf32> to vector<1x4x256xf32>
    %79 = vector.shape_cast %78 : vector<1x4x256xf32> to vector<4x256xf32>
    %cst_44 = arith.constant dense<0.000000e+00> : vector<8x256xf32>
    %80 = tpu.matmul %77, %79, %cst_44 {dimension_numbers = #tpu.dot_dimension_numbers<[1], [0], [0], [1], [0, 0, 1, 1], [], []>} : vector<8x4xf32>, vector<4x256xf32>, vector<8x256xf32> -> vector<8x256xf32>
    %81 = arith.addf %75, %80 : vector<8x256xf32>
    %cst_45 = arith.constant dense<0.000000e+00> : vector<8x256xf32>
    %82 = tpu.matmul %2, %81, %cst_45 {dimension_numbers = #tpu.dot_dimension_numbers<[1], [0], [0], [1], [0, 0, 1, 1], [], []>} : vector<8x8xf32>, vector<8x256xf32>, vector<8x256xf32> -> vector<8x256xf32>
    %83 = vector.broadcast %16 : vector<8x1xf32> to vector<8x256xf32>
    %84 = arith.addf %82, %83 : vector<8x256xf32>
    %c0_46 = arith.constant 0 : index
    %c0_47 = arith.constant 0 : index
    %c0_48 = arith.constant 0 : index
    %85 = vector.load %arg8[%c0_46, %c0_47, %c0_48] : memref<2x8x256xf32, #tpu.memory_space<vmem>>, vector<1x8x256xf32>
    %86 = vector.shape_cast %85 : vector<1x8x256xf32> to vector<8x256xf32>
    %87 = vector.shape_cast %84 : vector<8x256xf32> to vector<1x8x256xf32>
    tpu.vector_store %arg8[%c0_46, %c0_47, %c0_48], %87 {strides = array<i32>} : memref<2x8x256xf32, #tpu.memory_space<vmem>>, vector<1x8x256xf32>,
    %c0_49 = arith.constant 0 : index
    %c0_50 = arith.constant 0 : index
    %c0_51 = arith.constant 0 : index
    %88 = vector.load %arg2[%c0_49, %c0_50, %c0_51] : memref<9x8x4xf32, #tpu.memory_space<vmem>>, vector<1x8x4xf32>
    %89 = vector.shape_cast %88 : vector<1x8x4xf32> to vector<8x4xf32>
    %90 = vector.extract_strided_slice %20 {offsets = [1, 0, 0], sizes = [1, 4, 256], strides = [1, 1, 1]} : vector<2x4x256xf32> to vector<1x4x256xf32>
    %91 = vector.shape_cast %90 : vector<1x4x256xf32> to vector<4x256xf32>
    %cst_52 = arith.constant dense<0.000000e+00> : vector<8x256xf32>
    %92 = tpu.matmul %89, %91, %cst_52 {dimension_numbers = #tpu.dot_dimension_numbers<[1], [0], [0], [1], [0, 0, 1, 1], [], []>} : vector<8x4xf32>, vector<4x256xf32>, vector<8x256xf32> -> vector<8x256xf32>
    %c1_53 = arith.constant 1 : index
    %c0_54 = arith.constant 0 : index
    %c0_55 = arith.constant 0 : index
    %93 = vector.load %arg2[%c1_53, %c0_54, %c0_55] : memref<9x8x4xf32, #tpu.memory_space<vmem>>, vector<1x8x4xf32>
    %94 = vector.shape_cast %93 : vector<1x8x4xf32> to vector<8x4xf32>
    %95 = vector.extract_strided_slice %21 {offsets = [1, 0, 0], sizes = [1, 4, 256], strides = [1, 1, 1]} : vector<2x4x256xf32> to vector<1x4x256xf32>
    %96 = vector.shape_cast %95 : vector<1x4x256xf32> to vector<4x256xf32>
    %cst_56 = arith.constant dense<0.000000e+00> : vector<8x256xf32>
    %97 = tpu.matmul %94, %96, %cst_56 {dimension_numbers = #tpu.dot_dimension_numbers<[1], [0], [0], [1], [0, 0, 1, 1], [], []>} : vector<8x4xf32>, vector<4x256xf32>, vector<8x256xf32> -> vector<8x256xf32>
    %98 = arith.addf %92, %97 : vector<8x256xf32>
    %c2_57 = arith.constant 2 : index
    %c0_58 = arith.constant 0 : index
    %c0_59 = arith.constant 0 : index
    %99 = vector.load %arg2[%c2_57, %c0_58, %c0_59] : memref<9x8x4xf32, #tpu.memory_space<vmem>>, vector<1x8x4xf32>
    %100 = vector.shape_cast %99 : vector<1x8x4xf32> to vector<8x4xf32>
    %101 = vector.extract_strided_slice %22 {offsets = [1, 0, 0], sizes = [1, 4, 256], strides = [1, 1, 1]} : vector<2x4x256xf32> to vector<1x4x256xf32>
    %102 = vector.shape_cast %101 : vector<1x4x256xf32> to vector<4x256xf32>
    %cst_60 = arith.constant dense<0.000000e+00> : vector<8x256xf32>
    %103 = tpu.matmul %100, %102, %cst_60 {dimension_numbers = #tpu.dot_dimension_numbers<[1], [0], [0], [1], [0, 0, 1, 1], [], []>} : vector<8x4xf32>, vector<4x256xf32>, vector<8x256xf32> -> vector<8x256xf32>
    %104 = arith.addf %98, %103 : vector<8x256xf32>
    %c3_61 = arith.constant 3 : index
    %c0_62 = arith.constant 0 : index
    %c0_63 = arith.constant 0 : index
    %105 = vector.load %arg2[%c3_61, %c0_62, %c0_63] : memref<9x8x4xf32, #tpu.memory_space<vmem>>, vector<1x8x4xf32>
    %106 = vector.shape_cast %105 : vector<1x8x4xf32> to vector<8x4xf32>
    %107 = vector.extract_strided_slice %23 {offsets = [1, 0, 0], sizes = [1, 4, 256], strides = [1, 1, 1]} : vector<2x4x256xf32> to vector<1x4x256xf32>
    %108 = vector.shape_cast %107 : vector<1x4x256xf32> to vector<4x256xf32>
    %cst_64 = arith.constant dense<0.000000e+00> : vector<8x256xf32>
    %109 = tpu.matmul %106, %108, %cst_64 {dimension_numbers = #tpu.dot_dimension_numbers<[1], [0], [0], [1], [0, 0, 1, 1], [], []>} : vector<8x4xf32>, vector<4x256xf32>, vector<8x256xf32> -> vector<8x256xf32>
    %110 = arith.addf %104, %109 : vector<8x256xf32>
    %c4_65 = arith.constant 4 : index
    %c0_66 = arith.constant 0 : index
    %c0_67 = arith.constant 0 : index
    %111 = vector.load %arg2[%c4_65, %c0_66, %c0_67] : memref<9x8x4xf32, #tpu.memory_space<vmem>>, vector<1x8x4xf32>
    %112 = vector.shape_cast %111 : vector<1x8x4xf32> to vector<8x4xf32>
    %113 = vector.extract_strided_slice %24 {offsets = [1, 0, 0], sizes = [1, 4, 256], strides = [1, 1, 1]} : vector<2x4x256xf32> to vector<1x4x256xf32>
    %114 = vector.shape_cast %113 : vector<1x4x256xf32> to vector<4x256xf32>
    %cst_68 = arith.constant dense<0.000000e+00> : vector<8x256xf32>
    %115 = tpu.matmul %112, %114, %cst_68 {dimension_numbers = #tpu.dot_dimension_numbers<[1], [0], [0], [1], [0, 0, 1, 1], [], []>} : vector<8x4xf32>, vector<4x256xf32>, vector<8x256xf32> -> vector<8x256xf32>
    %116 = arith.addf %110, %115 : vector<8x256xf32>
    %c5_69 = arith.constant 5 : index
    %c0_70 = arith.constant 0 : index
    %c0_71 = arith.constant 0 : index
    %117 = vector.load %arg2[%c5_69, %c0_70, %c0_71] : memref<9x8x4xf32, #tpu.memory_space<vmem>>, vector<1x8x4xf32>
    %118 = vector.shape_cast %117 : vector<1x8x4xf32> to vector<8x4xf32>
    %119 = vector.extract_strided_slice %25 {offsets = [1, 0, 0], sizes = [1, 4, 256], strides = [1, 1, 1]} : vector<2x4x256xf32> to vector<1x4x256xf32>
    %120 = vector.shape_cast %119 : vector<1x4x256xf32> to vector<4x256xf32>
    %cst_72 = arith.constant dense<0.000000e+00> : vector<8x256xf32>
    %121 = tpu.matmul %118, %120, %cst_72 {dimension_numbers = #tpu.dot_dimension_numbers<[1], [0], [0], [1], [0, 0, 1, 1], [], []>} : vector<8x4xf32>, vector<4x256xf32>, vector<8x256xf32> -> vector<8x256xf32>
    %122 = arith.addf %116, %121 : vector<8x256xf32>
    %c6_73 = arith.constant 6 : index
    %c0_74 = arith.constant 0 : index
    %c0_75 = arith.constant 0 : index
    %123 = vector.load %arg2[%c6_73, %c0_74, %c0_75] : memref<9x8x4xf32, #tpu.memory_space<vmem>>, vector<1x8x4xf32>
    %124 = vector.shape_cast %123 : vector<1x8x4xf32> to vector<8x4xf32>
    %125 = vector.extract_strided_slice %26 {offsets = [1, 0, 0], sizes = [1, 4, 256], strides = [1, 1, 1]} : vector<2x4x256xf32> to vector<1x4x256xf32>
    %126 = vector.shape_cast %125 : vector<1x4x256xf32> to vector<4x256xf32>
    %cst_76 = arith.constant dense<0.000000e+00> : vector<8x256xf32>
    %127 = tpu.matmul %124, %126, %cst_76 {dimension_numbers = #tpu.dot_dimension_numbers<[1], [0], [0], [1], [0, 0, 1, 1], [], []>} : vector<8x4xf32>, vector<4x256xf32>, vector<8x256xf32> -> vector<8x256xf32>
    %128 = arith.addf %122, %127 : vector<8x256xf32>
    %c7_77 = arith.constant 7 : index
    %c0_78 = arith.constant 0 : index
    %c0_79 = arith.constant 0 : index
    %129 = vector.load %arg2[%c7_77, %c0_78, %c0_79] : memref<9x8x4xf32, #tpu.memory_space<vmem>>, vector<1x8x4xf32>
    %130 = vector.shape_cast %129 : vector<1x8x4xf32> to vector<8x4xf32>
    %131 = vector.extract_strided_slice %27 {offsets = [1, 0, 0], sizes = [1, 4, 256], strides = [1, 1, 1]} : vector<2x4x256xf32> to vector<1x4x256xf32>
    %132 = vector.shape_cast %131 : vector<1x4x256xf32> to vector<4x256xf32>
    %cst_80 = arith.constant dense<0.000000e+00> : vector<8x256xf32>
    %133 = tpu.matmul %130, %132, %cst_80 {dimension_numbers = #tpu.dot_dimension_numbers<[1], [0], [0], [1], [0, 0, 1, 1], [], []>} : vector<8x4xf32>, vector<4x256xf32>, vector<8x256xf32> -> vector<8x256xf32>
    %134 = arith.addf %128, %133 : vector<8x256xf32>
    %c8_81 = arith.constant 8 : index
    %c0_82 = arith.constant 0 : index
    %c0_83 = arith.constant 0 : index
    %135 = vector.load %arg2[%c8_81, %c0_82, %c0_83] : memref<9x8x4xf32, #tpu.memory_space<vmem>>, vector<1x8x4xf32>
    %136 = vector.shape_cast %135 : vector<1x8x4xf32> to vector<8x4xf32>
    %137 = vector.extract_strided_slice %28 {offsets = [1, 0, 0], sizes = [1, 4, 256], strides = [1, 1, 1]} : vector<2x4x256xf32> to vector<1x4x256xf32>
    %138 = vector.shape_cast %137 : vector<1x4x256xf32> to vector<4x256xf32>
    %cst_84 = arith.constant dense<0.000000e+00> : vector<8x256xf32>
    %139 = tpu.matmul %136, %138, %cst_84 {dimension_numbers = #tpu.dot_dimension_numbers<[1], [0], [0], [1], [0, 0, 1, 1], [], []>} : vector<8x4xf32>, vector<4x256xf32>, vector<8x256xf32> -> vector<8x256xf32>
    %140 = arith.addf %134, %139 : vector<8x256xf32>
    %cst_85 = arith.constant dense<0.000000e+00> : vector<8x256xf32>
    %141 = tpu.matmul %2, %140, %cst_85 {dimension_numbers = #tpu.dot_dimension_numbers<[1], [0], [0], [1], [0, 0, 1, 1], [], []>} : vector<8x8xf32>, vector<8x256xf32>, vector<8x256xf32> -> vector<8x256xf32>
    %142 = vector.broadcast %16 : vector<8x1xf32> to vector<8x256xf32>
    %143 = arith.addf %141, %142 : vector<8x256xf32>
    %c1_86 = arith.constant 1 : index
    %c0_87 = arith.constant 0 : index
    %c0_88 = arith.constant 0 : index
    %144 = vector.load %arg8[%c1_86, %c0_87, %c0_88] : memref<2x8x256xf32, #tpu.memory_space<vmem>>, vector<1x8x256xf32>
    %145 = vector.shape_cast %144 : vector<1x8x256xf32> to vector<8x256xf32>
    %146 = vector.shape_cast %143 : vector<8x256xf32> to vector<1x8x256xf32>
    tpu.vector_store %arg8[%c1_86, %c0_87, %c0_88], %146 {strides = array<i32>} : memref<2x8x256xf32, #tpu.memory_space<vmem>>, vector<1x8x256xf32>,
    return
  }
  func.func @transform_0(%arg0: i32) -> (i32, i32, i32) {
    %c0_i32 = arith.constant 0 : i32
    %c0_i32_0 = arith.constant 0 : i32
    %c0_i32_1 = arith.constant 0 : i32
    %c0_i32_2 = arith.constant 0 : i32
    return %c0_i32, %c0_i32_0, %c0_i32_1 : i32, i32, i32
  }
  func.func @transform_1(%arg0: i32) -> (i32, i32, i32) {
    %c0_i32 = arith.constant 0 : i32
    %c0_i32_0 = arith.constant 0 : i32
    %c0_i32_1 = arith.constant 0 : i32
    %c0_i32_2 = arith.constant 0 : i32
    return %c0_i32, %c0_i32_0, %c0_i32_1 : i32, i32, i32
  }
  func.func @transform_2(%arg0: i32) -> (i32, i32) {
    %c0_i32 = arith.constant 0 : i32
    %c0_i32_0 = arith.constant 0 : i32
    %c0_i32_1 = arith.constant 0 : i32
    return %c0_i32, %c0_i32_0 : i32, i32
  }
  func.func @transform_3(%arg0: i32) -> (i32, i32) {
    %c0_i32 = arith.constant 0 : i32
    %c0_i32_0 = arith.constant 0 : i32
    %c0_i32_1 = arith.constant 0 : i32
    return %c0_i32, %c0_i32_0 : i32, i32
  }
  func.func @transform_4(%arg0: i32) -> (i32, i32) {
    %c0_i32 = arith.constant 0 : i32
    %c0_i32_0 = arith.constant 0 : i32
    %c0_i32_1 = arith.constant 0 : i32
    return %c0_i32, %c0_i32_0 : i32, i32
  }
  func.func @transform_5(%arg0: i32) -> (i32, i32) {
    %c0_i32 = arith.constant 0 : i32
    %c0_i32_0 = arith.constant 0 : i32
    %c0_i32_1 = arith.constant 0 : i32
    return %c0_i32, %c0_i32_0 : i32, i32
  }
  func.func @transform_6(%arg0: i32) -> (i32, i32) {
    %c0_i32 = arith.constant 0 : i32
    %c0_i32_0 = arith.constant 0 : i32
    %c0_i32_1 = arith.constant 0 : i32
    return %c0_i32, %c0_i32_0 : i32, i32
  }
  func.func @transform_7(%arg0: i32) -> (i32, i32, i32) {
    %c0_i32 = arith.constant 0 : i32
    %c0_i32_0 = arith.constant 0 : i32
    %c0_i32_1 = arith.constant 0 : i32
    %c0_i32_2 = arith.constant 0 : i32
    return %c0_i32, %c0_i32_0, %c0_i32_1 : i32, i32, i32
  }
}

</mosaic_0001>

<bundles_post_ra>
// kernel: conv_test_forward.1
= control target key start
LH: loop header
LB: loop body
LE: loop exit
PB: predicated region body
PF: predicated region fallthrough
CT: control target
= control target key end

     0   :  { %v1314_v0 = vmov 0.0   ;;  %s1315_s24 = smov 127   ;;  %s1316_s27 = smov 126   ;;  %vm32_vm0 = vcmask 1043456   ;;  %vm28_vm1 = vcmask 31744   ;;  %vm97_vm2 = vcmask 1039360   ;;  %s1692_s0 = inlined_call_operand.vmem [shape: f32[2,4,256], index: 0, kind: input, shape index: {}]   ;;  %s1693_s2 = inlined_call_operand.vmem [shape: f32[4,8], index: 2, kind: input, shape index: {}]   ;;  %s1694_s3 = inlined_call_operand.vmem [shape: f32[8,4], index: 3, kind: input, shape index: {}]   ;;  %s1695_s5 = inlined_call_operand.vmem [shape: f32[1,4], index: 5, kind: input, shape index: {}]   ;;  %s1696_s4 = inlined_call_operand.vmem [shape: f32[1,8], index: 4, kind: input, shape index: {}]   ;;  %s1697_s1 = inlined_call_operand.vmem [shape: f32[9,8,4], index: 1, kind: input, shape index: {}]   ;;  %s1698_s6 = inlined_call_operand.vmem [shape: f32[8,1], index: 6, kind: input, shape index: {}]   ;;  %s1699_s7 = inlined_call_operand.vmem [shape: f32[2,8,256], index: 7, kind: output, shape index: {}]  }
   0x1   :  { %95 = vrot.lane.b32.xlu1 %v1314_v0, %s1315_s24  ;;  %v76_v1 = vld [vmem:[%s1692_s0] sm:$0xff]  ;;  %s1317_s28 = smov 112   ;;  %s1318_s29 = smov 111   ;;  %v77_v4 = vld [vmem:[%s1692_s0 + $0x8] sm:$0xff]  ;;  %vm202_vm3 = vcmask 1031168   ;;  %vm382_vm4 = vcmask 900096  }
   0x2   :  { %80 = vst [vmem:[#allocation1] ss:$2 sm:$0xff] %v76_v1  ;;  %s1319_s30 = smov 110   ;;  %s1320_s10 = smov 96   ;;  %v27_v5 = vld [vmem:[%s1693_s2] sm:$0xf] }
   0x3   :  { %84 = vst [vmem:[#allocation1 + $0x10] ss:$2 sm:$0xff] %v77_v4  ;;  %v1389_v6 = vld [vmem:[%s1694_s3] sm:$0xff]  ;;  %1205 = vmatpush.msk.msra.mxu0 %vm32_vm0, %v27_v5  ;;  %s1321_s0 = smov 95   ;;  %s1322_s2 = smov 94   ;;  %v1463_v20 = vld [vmem:[%s1697_s1 + $0x8] sm:$0xff] }
   0x4   :  { %1206 = vmatmul.msk.f32.vlgmr.msra.gmra.mxu0 %vm28_vm1, %v1389_v6  ;;  %v1440_v10 = vld [vmem:[%s1697_s1] sm:$0xff]  ;;  %vm262_vm5 = vcmask 916480   ;;  %v1482_v28 = vld [vmem:[%s1697_s1 + $0x10] sm:$0xff]  ;;  %v1487_v29 = vld [vmem:[%s1697_s1 + $0x18] sm:$0xff]  ;;  %vm442_vm6 = vcmask 785408   ;;  %vm322_vm7 = vcmask 908288  }
   0x5   :  { %v1507_v36 = vld [vmem:[%s1697_s1 + $0x20] sm:$0xff]  ;;  %v1512_v37 = vld [vmem:[%s1697_s1 + $0x28] sm:$0xff]  ;;  %v1528_v43 = vld [vmem:[%s1697_s1 + $0x30] sm:$0xff]  ;;  %vm562_vm8 = vcmask 769024   ;;  %vm502_vm9 = vcmask 777216   ;;  %vm61_vm10 = vcmask 64512  }
   0x6   :  { %v1540_v49 = vld [vmem:[%s1697_s1 + $0x38] sm:$0xff]  ;;  %v1545_v50 = vld [vmem:[%s1697_s1 + $0x40] sm:$0xff] }
   0x7   :  { %v1312_v53 = vld [vmem:[%s1695_s5] ss:$0 sm:$0xff] }
   0x8   :  { %v1313_v54 = vld [vmem:[%s1696_s4] ss:$0 sm:$0xff]  ;;  %v69_v55 = vmul.f32 %v1312_v53, %v1389_v6 }
   0x9   :  { %v82_v2 = vld.sshfl [vmem:[#allocation1 + $0x8] sm:$0xff pattern:$0x75316420]  ;;  %v81_v3 = vld.sshfl [vmem:[#allocation1] sm:$0xff pattern:$0x75316420] }
   0xa   :  { %198 = vrot.lane.b32.xlu2 %v82_v2, %s1316_s27  ;;  %196 = vrot.lane.b32.xlu1 %v81_v3, %s1316_s27  ;;  %v1405_v7 = vld.sshfl [vmem:[#allocation1 + $0x18] sm:$0xff pattern:$0x75316420]  ;;  %v1411_v8 = vld.sshfl [vmem:[#allocation1 + $0x10] sm:$0xff pattern:$0x75316420] }
   0xb   :  { %91 = vrot.lane.b32.xlu0 %v81_v3, %s1315_s24  ;;  %1212 = vmatpush.msk.msra.mxu3 %vm32_vm0, %v81_v3  ;;  %v70_v57 = vsel %vm28_vm1, %v69_v55, 0.0  ;;  %v1323_v55 = vmov 0  }
   0xc   :  { %1214 = vmatpush.msk.msrb.mxu0 %vm32_vm0, %v82_v2  ;;  %1213 = vmatmul.msk.f32.vlgmr.msra.gmra.mxu3 %vm28_vm1, %v1440_v10 }
   0xd   :  { %1215 = vmatmul.msk.f32.vlgmr.msrb.gmra.mxu0 %vm28_vm1, %v1440_v10  ;;  %1311 = vset.pattern.permute.xlu0 %v1323_v55 }
  0x12   :  { %256 = vrot.lane.b32.xlu2 %v81_v3, %s1317_s28  ;;  %200 = vrot.lane.b32.xlu1 %v1314_v0, %s1316_s27 }
  0x13   :  { %93 = vrot.lane.b32.xlu0 %v82_v2, %s1315_s24 }
  0x1a   :  { %316 = vrot.lane.b32.xlu2 %v81_v3, %s1318_s29  ;;  %376 = vrot.lane.b32.xlu1 %v81_v3, %s1319_s30 }
  0x1b   :  { %258 = vrot.lane.b32.xlu0 %v82_v2, %s1317_s28 }
  0x22   :  { %378 = vrot.lane.b32.xlu2 %v82_v2, %s1319_s30  ;;  %436 = vrot.lane.b32.xlu1 %v81_v3, %s1320_s10 }
  0x23   :  { %318 = vrot.lane.b32.xlu0 %v82_v2, %s1318_s29 }
  0x2a   :  { %438 = vrot.lane.b32.xlu2 %v82_v2, %s1320_s10  ;;  %498 = vrot.lane.b32.xlu1 %v82_v2, %s1321_s0 }
  0x2b   :  { %320 = vrot.lane.b32.xlu0 %v1314_v0, %s1318_s29 }
  0x32   :  { %260 = vrot.lane.b32.xlu2 %v1314_v0, %s1317_s28  ;;  %556 = vrot.lane.b32.xlu1 %v81_v3, %s1322_s2 }
  0x33   :  { %496 = vrot.lane.b32.xlu0 %v81_v3, %s1321_s0 }
  0x3a   :  { %558 = vrot.lane.b32.xlu2 %v82_v2, %s1322_s2  ;;  %560 = vrot.lane.b32.xlu1 %v1314_v0, %s1322_s2 }
  0x3b   :  { %440 = vrot.lane.b32.xlu0 %v1314_v0, %s1320_s10 }
  0x42   :  { %500 = vrot.lane.b32.xlu2 %v1314_v0, %s1321_s0  ;;  %668 = vrot.lane.b32.xlu1 %v1405_v7, %s1315_s24 }
  0x43   :  { %380 = vrot.lane.b32.xlu0 %v1314_v0, %s1319_s30 }
  0x4a   :  { %767 = vrot.lane.b32.xlu2 %v1411_v8, %s1316_s27  ;;  %823 = vrot.lane.b32.xlu1 %v1411_v8, %s1317_s28 }
  0x4b   :  { %666 = vrot.lane.b32.xlu0 %v1411_v8, %s1315_s24 }
  0x52   :  { %825 = vrot.lane.b32.xlu2 %v1405_v7, %s1317_s28  ;;  %881 = vrot.lane.b32.xlu1 %v1405_v7, %s1318_s29 }
  0x53   :  { %769 = vrot.lane.b32.xlu0 %v1405_v7, %s1316_s27 }
  0x5a   :  { %935 = vrot.lane.b32.xlu2 %v1411_v8, %s1319_s30  ;;  %991 = vrot.lane.b32.xlu1 %v1411_v8, %s1320_s10 }
  0x5b   :  { %879 = vrot.lane.b32.xlu0 %v1411_v8, %s1318_s29 }
  0x62   :  { %993 = vrot.lane.b32.xlu2 %v1405_v7, %s1320_s10  ;;  %1049 = vrot.lane.b32.xlu1 %v1405_v7, %s1321_s0 }
  0x63   :  { %937 = vrot.lane.b32.xlu0 %v1405_v7, %s1319_s30 }
  0x64   :  { %v199_v9 = vpop.permute.xlu2 %198 }
  0x6a   :  { %1103 = vrot.lane.b32.xlu2 %v1411_v8, %s1322_s2 }
  0x6b   :  { %1047 = vrot.lane.b32.xlu0 %v1411_v8, %s1321_s0 }
  0x6c   :  { %v257_v11 = vpop.permute.xlu2 %256 }
  0x73   :  { %1105 = vrot.lane.b32.xlu0 %v1405_v7, %s1322_s2  ;;  %v1452_v12 = vpop.permute.xlu1 %95 }
  0x74   :  { %v317_v13 = vpop.permute.xlu2 %316 }
  0x7c   :  { %v1454_v14 = vpop.permute.xlu2 %378  ;;  %v197_v15 = vpop.permute.xlu1 %196 }
  0x7d   :  { %v92_v16 = vpop.permute.xlu0 %91  ;;  %v203_v24 = vsel %vm202_vm3, %v197_v15, %v199_v9 }
  0x81   :  { %v1549_v52 = vpop.f32.mrf.mxu0 }
  0x82   :  { %v60_v56 = vmul.f32 %v1313_v54, %v1549_v52 }
  0x84   :  { %v1456_v17 = vpop.permute.xlu2 %438  ;;  %v1458_v18 = vpop.permute.xlu1 %200  ;;  %v62_v58 = vsel %vm61_vm10, %v60_v56, 0.0 }
  0x85   :  { %v94_v19 = vpop.permute.xlu0 %93  ;;  %v204_v21 = vsel %vm202_vm3, %v199_v9, %v1458_v18 }
  0x86   :  { %v98_v22 = vsel %vm97_vm2, %v92_v16, %v94_v19  ;;  %v99_v23 = vsel %vm97_vm2, %v94_v19, %v1452_v12 }
  0x87   :  { %1208 = vmatpush.msk.msra.mxu1 %vm32_vm0, %v98_v22  ;;  %1210 = vmatpush.msk.msra.mxu2 %vm32_vm0, %v99_v23 }
  0x88   :  { %1209 = vmatmul.msk.f32.vlgmr.msra.gmra.mxu1 %vm28_vm1, %v1463_v20  ;;  %1211 = vmatmul.msk.f32.vlgmr.msra.gmra.mxu2 %vm28_vm1, %v1463_v20 }
  0x89   :  { %1219 = vmatpush.msk.msrb.mxu2 %vm32_vm0, %v204_v21  ;;  %1217 = vmatpush.msk.msrb.mxu1 %vm32_vm0, %v203_v24 }
  0x8c   :  { %v261_v25 = vpop.permute.xlu2 %260  ;;  %v377_v26 = vpop.permute.xlu1 %376  ;;  %63 = vadd.xlane.f32.xlu1 %v62_v58 }
  0x8d   :  { %v259_v27 = vpop.permute.xlu0 %258  ;;  %v383_v30 = vsel %vm382_vm4, %v377_v26, %v1454_v14 }
  0x8e   :  { %v264_v31 = vsel %vm262_vm5, %v259_v27, %v261_v25  ;;  %v263_v32 = vsel %vm262_vm5, %v257_v11, %v259_v27 }
  0x8f   :  { %1222 = vmatpush.msk.msrb.mxu3 %vm32_vm0, %v263_v32  ;;  %1224 = vmatpush.msk.msra.mxu0 %vm32_vm0, %v264_v31 }
  0x90   :  { %1218 = vmatmul.msk.f32.vlgmr.msrb.gmra.mxu1 %vm28_vm1, %v1482_v28  ;;  %1223 = vmatmul.msk.f32.vlgmr.msrb.gmra.mxu3 %vm28_vm1, %v1487_v29 }
  0x91   :  { %1232 = vmatpush.msk.msra.mxu3 %vm32_vm0, %v383_v30  ;;  %1220 = vmatmul.msk.f32.vlgmr.msrb.gmra.mxu2 %vm28_vm1, %v1482_v28 }
  0x92   :  { %1225 = vmatmul.msk.f32.vlgmr.msra.gmra.mxu0 %vm28_vm1, %v1487_v29 }
  0x93   :  { %71 = vadd.xlane.f32.xlu2 %v70_v57 }
  0x94   :  { %v559_v33 = vpop.permute.xlu2 %558  ;;  %v437_v34 = vpop.permute.xlu1 %436 }
  0x95   :  { %v319_v35 = vpop.permute.xlu0 %318  ;;  %v443_v38 = vsel %vm442_vm6, %v437_v34, %v1456_v17 }
  0x96   :  { %v323_v39 = vsel %vm322_vm7, %v317_v13, %v319_v35 }
  0x97   :  { %1227 = vmatpush.msk.msra.mxu1 %vm32_vm0, %v323_v39 }
  0x98   :  { %1228 = vmatmul.msk.f32.vlgmr.msra.gmra.mxu1 %vm28_vm1, %v1507_v36  ;;  %1233 = vmatmul.msk.f32.vlgmr.msra.gmra.mxu3 %vm28_vm1, %v1512_v37 }
  0x99   :  { %1237 = vmatpush.msk.msrb.mxu1 %vm32_vm0, %v443_v38 }
  0x9c   :  { %v1523_v40 = vpop.permute.xlu2 %500  ;;  %v499_v41 = vpop.permute.xlu1 %498 }
  0x9d   :  { %v321_v42 = vpop.permute.xlu0 %320  ;;  %v504_v5 = vsel %vm502_vm9, %v499_v41, %v1523_v40 }
  0x9e   :  { %v324_v44 = vsel %vm322_vm7, %v319_v35, %v321_v42 }
  0x9f   :  { %1229 = vmatpush.msk.msra.mxu2 %vm32_vm0, %v324_v44 }
  0xa0   :  { %1238 = vmatmul.msk.f32.vlgmr.msrb.gmra.mxu1 %vm28_vm1, %v1528_v43  ;;  %1230 = vmatmul.msk.f32.vlgmr.msra.gmra.mxu2 %vm28_vm1, %v1507_v36 }
  0xa4   :  { %v768_v45 = vpop.permute.xlu2 %767  ;;  %v557_v46 = vpop.permute.xlu1 %556 }
  0xa5   :  { %v563_v47 = vsel %vm562_vm8, %v557_v46, %v559_v33  ;;  %v497_v48 = vpop.permute.xlu0 %496 }
  0xa6   :  { %v503_v51 = vsel %vm502_vm9, %v497_v48, %v499_v41  ;;  %1247 = vmatpush.msk.msra.mxu1 %vm32_vm0, %v563_v47  ;;  %v74_v47 = vld [vmem:[%s1698_s6] sm:$0xff] }
  0xa7   :  { %1242 = vmatpush.msk.msrb.mxu3 %vm32_vm0, %v503_v51 }
  0xa8   :  { %1243 = vmatmul.msk.f32.vlgmr.msrb.gmra.mxu3 %vm28_vm1, %v1540_v49  ;;  %1248 = vmatmul.msk.f32.vlgmr.msra.gmra.mxu1 %vm28_vm1, %v1545_v50 }
  0xac   :  { %v826_v59 = vpop.permute.xlu2 %825  ;;  %v561_v60 = vpop.permute.xlu1 %560 }
  0xad   :  { %v1567_v61 = vsel %vm262_vm5, %v826_v59, %v261_v25  ;;  %v441_v62 = vpop.permute.xlu0 %440  ;;  %v564_v63 = vsel %vm562_vm8, %v559_v33, %v561_v60  ;;  %v171_v33 = vpop.f32.mrf.mxu3 }
  0xae   :  { %v444_v0 = vsel %vm442_vm6, %v1456_v17, %v441_v62 }
  0xaf   :  { %1239 = vmatpush.msk.msrb.mxu2 %vm32_vm0, %v444_v0 }
  0xb0   :  { %1240 = vmatmul.msk.f32.vlgmr.msrb.gmra.mxu2 %vm28_vm1, %v1528_v43 }
  0xb1   :  { %1249 = vmatpush.msk.msra.mxu2 %vm32_vm0, %v564_v63 }
  0xb4   :  { %v669_v1 = vpop.permute.xlu1 %668  ;;  %v936_v6 = vpop.permute.xlu2 %935 }
  0xb5   :  { %v671_v2 = vsel %vm97_vm2, %v669_v1, %v1452_v12  ;;  %v381_v3 = vpop.permute.xlu0 %380 }
  0xb6   :  { %v384_v4 = vsel %vm382_vm4, %v1454_v14, %v381_v3  ;;  %1256 = vmatpush.msk.msrb.mxu2 %vm32_vm0, %v671_v2 }
  0xb7   :  { %1234 = vmatpush.msk.msrb.mxu0 %vm32_vm0, %v384_v4 }
  0xb8   :  { %1235 = vmatmul.msk.f32.vlgmr.msrb.gmra.mxu0 %vm28_vm1, %v1512_v37  ;;  %1250 = vmatmul.msk.f32.vlgmr.msra.gmra.mxu2 %vm28_vm1, %v1545_v50 }
  0xb9   :  { %1244 = vmatpush.msk.msra.mxu0 %vm32_vm0, %v504_v5 }
  0xbc   :  { %v824_v9 = vpop.permute.xlu1 %823  ;;  %v994_v17 = vpop.permute.xlu2 %993 }
  0xbd   :  { %v1590_v11 = vsel %vm262_vm5, %v824_v9, %v826_v59  ;;  %v667_v12 = vpop.permute.xlu0 %666  ;;  %v996_v22 = vsel %vm442_vm6, %v994_v17, %v441_v62 }
  0xbe   :  { %v670_v13 = vsel %vm97_vm2, %v667_v12, %v669_v1 }
  0xbf   :  { %1254 = vmatpush.msk.msrb.mxu1 %vm32_vm0, %v670_v13 }
  0xc0   :  { %1245 = vmatmul.msk.f32.vlgmr.msra.gmra.mxu0 %vm28_vm1, %v1540_v49  ;;  %1257 = vmatmul.msk.f32.vlgmr.msrb.gmra.mxu2 %vm28_vm1, %v1463_v20 }
  0xc1   :  { %1255 = vmatmul.msk.f32.vlgmr.msrb.gmra.mxu1 %vm28_vm1, %v1463_v20 }
  0xc4   :  { %v882_v14 = vpop.permute.xlu1 %881  ;;  %v1104_v35 = vpop.permute.xlu2 %1103 }
  0xc5   :  { %v884_v15 = vsel %vm322_vm7, %v882_v14, %v321_v42  ;;  %v770_v16 = vpop.permute.xlu0 %769 }
  0xc6   :  { %v771_v19 = vsel %vm202_vm3, %v768_v45, %v770_v16  ;;  %v772_v21 = vsel %vm202_vm3, %v770_v16, %v1458_v18 }
  0xc7   :  { %1265 = vmatpush.msk.msra.mxu2 %vm32_vm0, %v772_v21  ;;  %1263 = vmatpush.msk.msra.mxu1 %vm32_vm0, %v771_v19 }
  0xc8   :  { %1266 = vmatmul.msk.f32.vlgmr.msra.gmra.mxu2 %vm28_vm1, %v1482_v28 }
  0xc9   :  { %1275 = vmatpush.msk.msrb.mxu2 %vm32_vm0, %v884_v15  ;;  %1264 = vmatmul.msk.f32.vlgmr.msra.gmra.mxu1 %vm28_vm1, %v1482_v28 }
  0xcb   :  { %1285 = vmatpush.msk.msra.mxu2 %vm32_vm0, %v996_v22 }
  0xcc   :  { %v992_v20 = vpop.permute.xlu1 %991 }
  0xcd   :  { %v995_v23 = vsel %vm442_vm6, %v992_v20, %v994_v17  ;;  %v880_v18 = vpop.permute.xlu0 %879 }
  0xce   :  { %v883_v24 = vsel %vm322_vm7, %v880_v18, %v882_v14 }
  0xcf   :  { %1273 = vmatpush.msk.msrb.mxu1 %vm32_vm0, %v883_v24 }
  0xd0   :  { %1276 = vmatmul.msk.f32.vlgmr.msrb.gmra.mxu2 %vm28_vm1, %v1507_v36 }
  0xd1   :  { %1283 = vmatpush.msk.msra.mxu1 %vm32_vm0, %v995_v23 }
  0xd2   :  { %1274 = vmatmul.msk.f32.vlgmr.msrb.gmra.mxu1 %vm28_vm1, %v1507_v36 }
  0xd4   :  { %v1050_v38 = vpop.permute.xlu1 %1049 }
  0xd5   :  { %v938_v25 = vpop.permute.xlu0 %937 }
  0xd6   :  { %v939_v26 = vsel %vm382_vm4, %v936_v6, %v938_v25  ;;  %v1623_v27 = vsel %vm382_vm4, %v938_v25, %v381_v3 }
  0xd8   :  { %1286 = vmatmul.msk.f32.vlgmr.msra.gmra.mxu2 %vm28_vm1, %v1528_v43 }
  0xda   :  { %1284 = vmatmul.msk.f32.vlgmr.msra.gmra.mxu1 %vm28_vm1, %v1528_v43 }
  0xdd   :  { %v1048_v28 = vpop.permute.xlu0 %1047 }
  0xde   :  { %v1051_v21 = vsel %vm502_vm9, %v1048_v28, %v1050_v38 }
  0xe5   :  { %v1106_v30 = vpop.permute.xlu0 %1105 }
  0xe6   :  { %v1108_v31 = vsel %vm562_vm8, %v1106_v30, %v561_v60  ;;  %v1107_v36 = vsel %vm562_vm8, %v1104_v35, %v1106_v30 }
  0xe7   :  { %1295 = vmatpush.msk.msrb.mxu2 %vm32_vm0, %v1108_v31  ;;  %1293 = vmatpush.msk.msrb.mxu1 %vm32_vm0, %v1107_v36 }
  0xe8   :  { %1296 = vmatmul.msk.f32.vlgmr.msrb.gmra.mxu2 %vm28_vm1, %v1545_v50  ;;  %1294 = vmatmul.msk.f32.vlgmr.msrb.gmra.mxu1 %vm28_vm1, %v1545_v50  ;;  %v191_v50 = vpop.f32.mrf.mxu0 }
  0xff   :  { %v64_v48 = vpop.xlane.xlu1 %63 }
 0x105   :  { %v124_v32 = vpop.f32.mrf.mxu1 }
 0x106   :  { %v172_v39 = vadd.f32 %v171_v33, %v124_v32  ;;  %v72_v46 = vpop.xlane.xlu2 %71 }
 0x107   :  { %v73_v51 = vadd.f32 %v72_v46, %v64_v48 }
 0x109   :  { %v75_v54 = vadd.f32 %v74_v47, %v73_v51 }
 0x10b   :  { %v144_v41 = vpop.f32.mrf.mxu2  ;;  %616 = vperm.xlu0 %1311, %v75_v54  }
 0x10c   :  { %v192_v60 = vadd.f32 %v191_v50, %v144_v41 }
 0x10d   :  { %v229_v34 = vpop.f32.mrf.mxu1 }
 0x10e   :  { %v252_v44 = vadd.f32 %v229_v34, %v172_v39 }
 0x10f   :  { %v309_v3 = vpop.f32.mrf.mxu0 }
 0x113   :  { %v289_v42 = vpop.f32.mrf.mxu3 }
 0x114   :  { %v312_v45 = vadd.f32 %v289_v42, %v252_v44  ;;  %v249_v53 = vpop.f32.mrf.mxu2 }
 0x115   :  { %v349_v43 = vpop.f32.mrf.mxu1  ;;  %v253_v4 = vadd.f32 %v249_v53, %v192_v60 }
 0x116   :  { %v372_v56 = vadd.f32 %v349_v43, %v312_v45 }
 0x117   :  { %v313_v6 = vadd.f32 %v309_v3, %v253_v4 }
 0x11b   :  { %v409_v57 = vpop.f32.mrf.mxu3 }
 0x11c   :  { %v432_v59 = vadd.f32 %v409_v57, %v372_v56 }
 0x11d   :  { %v469_v58 = vpop.f32.mrf.mxu1 }
 0x11e   :  { %v492_v62 = vadd.f32 %v469_v58, %v432_v59 }
 0x123   :  { %v369_v63 = vpop.f32.mrf.mxu2 }
 0x124   :  { %v373_v13 = vadd.f32 %v369_v63, %v313_v6 }
 0x125   :  { %v589_v1 = vpop.f32.mrf.mxu1 }
 0x12b   :  { %v529_v0 = vpop.f32.mrf.mxu3 }
 0x12c   :  { %v552_v2 = vadd.f32 %v529_v0, %v492_v62 }
 0x12e   :  { %v612_v5 = vadd.f32 %v589_v1, %v552_v2 }
 0x130   :  { %637 = vmatpush.msra.mxu3 %v612_v5 }
 0x131   :  { %1251 = vmatmul.msk.f32.vlgmr.msra.gmra.mxu3 %vm61_vm10, %v1549_v52 }
 0x132   :  { %1258 = vmatpush.msk.msrb.mxu3 %vm32_vm0, %v1411_v8  ;;  %v1052_v8 = vsel %vm502_vm9, %v1050_v38, %v1523_v40 }
 0x133   :  { %v489_v9 = vpop.f32.mrf.mxu2 }
 0x134   :  { %1268 = vmatpush.msk.msra.mxu3 %vm32_vm0, %v1590_v11 }
 0x135   :  { %v429_v12 = vpop.f32.mrf.mxu0 }
 0x136   :  { %v433_v14 = vadd.f32 %v429_v12, %v373_v13 }
 0x138   :  { %v493_v15 = vadd.f32 %v489_v9, %v433_v14 }
 0x139   :  { %1259 = vmatmul.msk.f32.vlgmr.msrb.gmra.mxu3 %vm28_vm1, %v1440_v10 }
 0x13a   :  { %1278 = vmatpush.msk.msrb.mxu3 %vm32_vm0, %v939_v26 }
 0x13b   :  { %v609_v17 = vpop.f32.mrf.mxu2 }
 0x13d   :  { %v549_v16 = vpop.f32.mrf.mxu0 }
 0x13e   :  { %v553_v19 = vadd.f32 %v549_v16, %v493_v15 }
 0x140   :  { %v613_v22 = vadd.f32 %v609_v17, %v553_v19 }
 0x141   :  { %1269 = vmatmul.msk.f32.vlgmr.msra.gmra.mxu3 %vm28_vm1, %v1487_v29 }
 0x142   :  { %657 = vmatpush.msrb.mxu0 %v613_v22  ;;  %1288 = vmatpush.msk.msra.mxu3 %vm32_vm0, %v1051_v21 }
 0x143   :  { %1252 = vmatmul.msk.f32.vlgmr.msrb.gmra.mxu0 %vm61_vm10, %v1549_v52  ;;  %v716_v40 = vpop.f32.mrf.mxu2 }
 0x144   :  { %1260 = vmatpush.msk.msra.mxu0 %vm32_vm0, %v1405_v7  ;;  %v696_v7 = vpop.f32.mrf.mxu1 }
 0x146   :  { %1270 = vmatpush.msk.msrb.mxu0 %vm32_vm0, %v1567_v61 }
 0x149   :  { %1279 = vmatmul.msk.f32.vlgmr.msrb.gmra.mxu3 %vm28_vm1, %v1512_v37 }
 0x14b   :  { %1261 = vmatmul.msk.f32.vlgmr.msra.gmra.mxu0 %vm28_vm1, %v1440_v10  ;;  %v817_v25 = vpop.f32.mrf.mxu2 }
 0x14c   :  { %1280 = vmatpush.msk.msra.mxu0 %vm32_vm0, %v1623_v27  ;;  %v797_v20 = vpop.f32.mrf.mxu1 }
 0x151   :  { %1289 = vmatmul.msk.f32.vlgmr.msra.gmra.mxu3 %vm28_vm1, %v1540_v49 }
 0x153   :  { %1271 = vmatmul.msk.f32.vlgmr.msrb.gmra.mxu0 %vm28_vm1, %v1487_v29  ;;  %v929_v32 = vpop.f32.mrf.mxu2 }
 0x154   :  { %1290 = vmatpush.msk.msrb.mxu0 %vm32_vm0, %v1052_v8  ;;  %v909_v18 = vpop.f32.mrf.mxu1 }
 0x15b   :  { %1281 = vmatmul.msk.f32.vlgmr.msra.gmra.mxu0 %vm28_vm1, %v1512_v37  ;;  %v1041_v45 = vpop.f32.mrf.mxu2 }
 0x15c   :  { %v1021_v30 = vpop.f32.mrf.mxu1 }
 0x163   :  { %1291 = vmatmul.msk.f32.vlgmr.msrb.gmra.mxu0 %vm28_vm1, %v1540_v49 }
 0x165   :  { %v1133_v42 = vpop.f32.mrf.mxu1 }
 0x16b   :  { %v1153_v55 = vpop.f32.mrf.mxu2 }
 0x17d   :  { %v617_v10 = vpop.permute.xlu0 %616 }
 0x1b4   :  { %v639_v61 = vpop.f32.mrf.mxu3 }
 0x1b5   :  { %v640_v11 = vadd.f32 %v639_v61, %v617_v10 }
 0x1b7   :  { %662 = vst [vmem:[%s1699_s7] sm:$0xff] %v640_v11 }
 0x1bc   :  { %v743_v23 = vpop.f32.mrf.mxu3 }
 0x1bd   :  { %v744_v26 = vadd.f32 %v743_v23, %v696_v7 }
 0x1bf   :  { %v820_v49 = vadd.f32 %v797_v20, %v744_v26 }
 0x1c0   :  { %v659_v29 = vpop.f32.mrf.mxu0 }
 0x1c1   :  { %v660_v24 = vadd.f32 %v659_v29, %v617_v10 }
 0x1c3   :  { %663 = vst [vmem:[%s1699_s7 + $0x8] sm:$0xff] %v660_v24 }
 0x1c4   :  { %v853_v37 = vpop.f32.mrf.mxu3 }
 0x1c5   :  { %v876_v28 = vadd.f32 %v853_v37, %v820_v49 }
 0x1c7   :  { %v932_v33 = vadd.f32 %v909_v18, %v876_v28 }
 0x1c8   :  { %v763_v27 = vpop.f32.mrf.mxu0 }
 0x1c9   :  { %v764_v34 = vadd.f32 %v763_v27, %v716_v40 }
 0x1cb   :  { %v821_v38 = vadd.f32 %v817_v25, %v764_v34 }
 0x1cc   :  { %v965_v31 = vpop.f32.mrf.mxu3 }
 0x1cd   :  { %v988_v35 = vadd.f32 %v965_v31, %v932_v33 }
 0x1cf   :  { %v1044_v39 = vadd.f32 %v1021_v30, %v988_v35 }
 0x1d0   :  { %v873_v36 = vpop.f32.mrf.mxu0 }
 0x1d1   :  { %v877_v43 = vadd.f32 %v873_v36, %v821_v38 }
 0x1d3   :  { %v933_v48 = vadd.f32 %v929_v32, %v877_v43 }
 0x1d4   :  { %v1077_v41 = vpop.f32.mrf.mxu3 }
 0x1d5   :  { %v1100_v44 = vadd.f32 %v1077_v41, %v1044_v39 }
 0x1d7   :  { %v1156_v46 = vadd.f32 %v1133_v42, %v1100_v44 }
 0x1d8   :  { %v985_v47 = vpop.f32.mrf.mxu0 }
 0x1d9   :  { %1173 = vmatpush.msrb.mxu3 %v1156_v46  ;;  %v989_v51 = vadd.f32 %v985_v47, %v933_v48 }
 0x1da   :  { %1297 = vmatmul.msk.f32.vlgmr.msrb.gmra.mxu3 %vm61_vm10, %v1549_v52 }
 0x1db   :  { %v1045_v53 = vadd.f32 %v1041_v45, %v989_v51 }
 0x1e0   :  { %v1097_v54 = vpop.f32.mrf.mxu0 }
 0x1e1   :  { %v1101_v56 = vadd.f32 %v1097_v54, %v1045_v53 }
 0x1e3   :  { %v1157_v50 = vadd.f32 %v1153_v55, %v1101_v56 }
 0x1e5   :  { %1193 = vmatpush.msra.mxu0 %v1157_v50 }
 0x1e6   :  { %1298 = vmatmul.msk.f32.vlgmr.msra.gmra.mxu0 %vm61_vm10, %v1549_v52 }
 0x25d   :  { %v1175_v57 = vpop.f32.mrf.mxu3 }
 0x25e   :  { %v1176_v58 = vadd.f32 %v1175_v57, %v617_v10 }
 0x260   :  { %1299 = vst [vmem:[%s1699_s7 + $0x10] sm:$0xff] %v1176_v58 }
 0x263   :  { %v1195_v59 = vpop.f32.mrf.mxu0 }
 0x264   :  { %v1196_v60 = vadd.f32 %v1195_v59, %v617_v10 }
 0x266   :  { %1300 = vst [vmem:[%s1699_s7 + $0x18] sm:$0xff] %v1196_v60 }

</bundles_post_ra>
